<compile_context>
chip_gen: v6e
topology: v6e:2x2x1
jax: 0.10.0
libtpu: 0.0.40
codegen_flags: <defaults>
</compile_context>

<pallas_src>
import jax
import jax.numpy as jnp
from jax.experimental import pallas as pl
from jax.experimental.pallas import tpu as pltpu

LEAKY_SLOPE = 0.01
BN_EPS = 1e-5
HIDDEN = 128


def _leaky_relu(x):
    return jnp.where(x > 0, x, LEAKY_SLOPE * x)


def _round_up(x, m):
    return ((x + m - 1) // m) * m


def critic_kernel(xcat_ref, wcat_ref, b1_ref, w2s_ref, b2_ref, w3_ref, b3_ref,
                  out_ref):
    """One batch tile of the Critic forward (BatchNorm already folded into wcat/b1)."""
    x = xcat_ref[...]                                                   # (TB, s_dim+act_dim)

    # Single packed 256-wide matmul: columns [:H] = BN-folded fc1 pre-activation,
    # columns [H:] = `actions @ w2a` partial sum of fc2 (block-diagonal weight).
    h = jnp.dot(x, wcat_ref[...], preferred_element_type=jnp.float32)   # (TB, 2H)
    h1 = _leaky_relu(h[:, :HIDDEN] + b1_ref[...])                       # (TB, H)
    act_partial = h[:, HIDDEN:]                                         # (TB, H)

    # fc2 over the (implicit) concat([h1, actions]) + leaky_relu.
    h2 = _leaky_relu(
        jnp.dot(h1, w2s_ref[...], preferred_element_type=jnp.float32)
        + act_partial + b2_ref[...])                                    # (TB, H)

    # fc3 (out_features = 1): VPU multiply + lane reduction -> lane-dense row.
    out_col = jnp.sum(h2 * w3_ref[...], axis=-1)                        # (TB,)
    out_ref[...] = (out_col[None, :] + b3_ref[...]).astype(out_ref.dtype)


def critic_forward(state, actions, params, *, tile_b=1024):
    """state: (B, s_dim) f32, actions: (B, a_dim*n_agents) f32 -> (B, 1) f32."""
    B, s_dim = state.shape
    act_dim = actions.shape[1]
    H = HIDDEN

    # ---- Fold training-mode BatchNorm1d (batch mean, biased var, affine) into fc1 ----
    mean = jnp.mean(state, axis=0, keepdims=True)                       # (1, s_dim)
    var = jnp.mean((state - mean) ** 2, axis=0, keepdims=True)          # (1, s_dim)
    scale = params["bn_gamma"][None, :] * jax.lax.rsqrt(var + BN_EPS)   # gamma / sqrt(var+eps)
    shift = params["bn_beta"][None, :] - mean * scale
    w1_eff = params["w1"] * scale.reshape(-1, 1)                        # (s_dim, H)
    b1_eff = params["b1"] + shift @ params["w1"]                        # (1, H)
    # TODO(synk): eval-mode BatchNorm (running_mean/var) not modeled; the reference
    # module's default forward uses training-mode batch statistics, matched here.

    # ---- Pack fc1 and the action half of fc2 into one block-diagonal 256-wide weight ----
    wcat = jnp.zeros((s_dim + act_dim, 2 * H), jnp.float32)
    wcat = wcat.at[:s_dim, :H].set(w1_eff)
    wcat = wcat.at[s_dim:, H:].set(params["w2a"])
    xcat = jnp.concatenate([state, actions], axis=1)                    # (B, s_dim+act_dim)

    # ---- Batch tiling (rows per tile: multiple of 8, capped at tile_b) ----
    tb = min(_round_up(tile_b, 8), _round_up(B, 8))
    b_pad = _round_up(B, tb)
    if b_pad != B:
        xcat = jnp.pad(xcat, ((0, b_pad - B), (0, 0)))
    num_tiles = b_pad // tb

    w3_row = params["w3"].reshape(1, H)
    b3 = params["b3"].reshape(1, 1)

    out = pl.pallas_call(
        critic_kernel,
        out_shape=jax.ShapeDtypeStruct((num_tiles, tb), jnp.float32),
        grid_spec=pltpu.PrefetchScalarGridSpec(
            num_scalar_prefetch=0,
            grid=(num_tiles,),
            in_specs=[
                pl.BlockSpec((tb, s_dim + act_dim), lambda i: (i, 0)),   # activations: tiled
                pl.BlockSpec((s_dim + act_dim, 2 * H), lambda i: (0, 0)),  # packed weight
                pl.BlockSpec((1, H), lambda i: (0, 0)),                  # b1_eff
                pl.BlockSpec((H, H), lambda i: (0, 0)),                  # w2s
                pl.BlockSpec((1, H), lambda i: (0, 0)),                  # b2
                pl.BlockSpec((1, H), lambda i: (0, 0)),                  # w3 (as a row)
                pl.BlockSpec((1, 1), lambda i: (0, 0)),                  # b3
            ],
            out_specs=pl.BlockSpec((1, tb), lambda i: (i, 0)),
        ),
        compiler_params=pltpu.CompilerParams(
            dimension_semantics=("parallel",)),                          # megacore on v7x
    )(xcat, wcat, b1_eff, params["w2s"], params["b2"], w3_row, b3)

    return out.reshape(-1)[:B].reshape(B, 1)


def init_params(key, s_dim, a_dim, n_agents, hidden=HIDDEN):
    """Deterministic synthetic init matching the PyTorch module's shapes/init."""
    act_dim = a_dim * n_agents
    k = jax.random.split(key, 6)
    lim1 = 1.0 / jnp.sqrt(jnp.float32(hidden))   # hidden_init uses weight.size(0) = out_features
    lim2 = 1.0 / jnp.sqrt(jnp.float32(hidden))
    lim3 = 0.003
    return {
        # stored as (in_features, out_features); biases as (1, out) rows
        "w1":  jax.random.uniform(k[0], (s_dim, hidden), jnp.float32, -lim1, lim1),
        "b1":  jax.random.uniform(k[1], (1, hidden), jnp.float32, -lim1, lim1),
        "w2s": jax.random.uniform(k[2], (hidden, hidden), jnp.float32, -lim2, lim2),
        "w2a": jax.random.uniform(k[3], (act_dim, hidden), jnp.float32, -lim2, lim2),
        "b2":  jax.random.uniform(k[4], (1, hidden), jnp.float32, -lim2, lim2),
        "w3":  jax.random.uniform(k[5], (hidden, 1), jnp.float32, -lim3, lim3),
        "b3":  jnp.zeros((1, 1), jnp.float32),
        # BatchNorm1d affine parameters (PyTorch defaults: gamma=1, beta=0)
        "bn_gamma": jnp.ones((s_dim,), jnp.float32),
        "bn_beta":  jnp.zeros((s_dim,), jnp.float32),
    }


def reference_forward(state, actions, params):
    """Pure-JAX reference of the exact module math, for sanity checking."""
    mean = jnp.mean(state, axis=0, keepdims=True)
    var = jnp.mean((state - mean) ** 2, axis=0, keepdims=True)
    xs = params["bn_gamma"][None, :] * (state - mean) / jnp.sqrt(var + BN_EPS) \
         + params["bn_beta"][None, :]
    h1 = _leaky_relu(xs @ params["w1"] + params["b1"])
    x = jnp.concatenate([h1, actions], axis=1)
    w2 = jnp.concatenate([params["w2s"], params["w2a"]], axis=0)
    h2 = _leaky_relu(x @ w2 + params["b2"])
    return h2 @ params["w3"] + params["b3"]


if __name__ == "__main__":
    B, S_DIM, A_DIM, N_AGENTS = 8, 32, 4, 2

    key = jax.random.PRNGKey(0)
    k_state, k_act, k_params = jax.random.split(key, 3)

    state = jax.random.normal(k_state, (B, S_DIM), jnp.float32)
    actions = jax.random.uniform(k_act, (B, A_DIM * N_AGENTS), jnp.float32, -1.0, 1.0)
    params = init_params(k_params, S_DIM, A_DIM, N_AGENTS)

    out = critic_forward(state, actions, params)
    out = jax.block_until_ready(out)

    ref = reference_forward(state, actions, params)
    assert out.shape == (B, 1)
    assert jnp.allclose(out, ref, atol=2e-3, rtol=2e-3), (
        f"max abs err = {jnp.max(jnp.abs(out - ref))}")

    print("KERNEL_OK")
</pallas_src>

<mosaic_0001>
module attributes {stable_mosaic.version = 11 : i64} {
  func.func @critic_kernel(%arg0: i32, %arg1: memref<8x40xf32, #tpu.memory_space<vmem>>, %arg2: memref<40x256xf32, #tpu.memory_space<vmem>>, %arg3: memref<1x128xf32, #tpu.memory_space<vmem>>, %arg4: memref<128x128xf32, #tpu.memory_space<vmem>>, %arg5: memref<1x128xf32, #tpu.memory_space<vmem>>, %arg6: memref<1x128xf32, #tpu.memory_space<vmem>>, %arg7: memref<1x1xf32, #tpu.memory_space<vmem>>, %arg8: memref<1x8xf32, #tpu.memory_space<vmem>>) attributes {dimension_semantics = [#tpu.dimension_semantics<parallel>], iteration_bounds = array<i64: 1>, scalar_prefetch = 0 : i64, scratch_operands = 0 : i64, tpu.core_type = #tpu.core_type<tc>, window_params = [{transform_indices = @transform_0, window_bounds = array<i64: 8, 40>}, {pipeline_mode = #tpu.pipeline_mode<synchronous>, transform_indices = @transform_1, window_bounds = array<i64: 40, 256>}, {pipeline_mode = #tpu.pipeline_mode<synchronous>, transform_indices = @transform_2, window_bounds = array<i64: 1, 128>}, {pipeline_mode = #tpu.pipeline_mode<synchronous>, transform_indices = @transform_3, window_bounds = array<i64: 128, 128>}, {pipeline_mode = #tpu.pipeline_mode<synchronous>, transform_indices = @transform_4, window_bounds = array<i64: 1, 128>}, {pipeline_mode = #tpu.pipeline_mode<synchronous>, transform_indices = @transform_5, window_bounds = array<i64: 1, 128>}, {pipeline_mode = #tpu.pipeline_mode<synchronous>, transform_indices = @transform_6, window_bounds = array<i64: 1, 1>}, {transform_indices = @transform_7, window_bounds = array<i64: 1, 8>}]} {
    %c0 = arith.constant 0 : index
    %c0_0 = arith.constant 0 : index
    %0 = vector.load %arg1[%c0, %c0_0] : memref<8x40xf32, #tpu.memory_space<vmem>>, vector<8x40xf32>
    %c0_1 = arith.constant 0 : index
    %c0_2 = arith.constant 0 : index
    %1 = vector.load %arg2[%c0_1, %c0_2] : memref<40x256xf32, #tpu.memory_space<vmem>>, vector<40x256xf32>
    %cst = arith.constant dense<0.000000e+00> : vector<8x256xf32>
    %2 = tpu.matmul %0, %1, %cst {dimension_numbers = #tpu.dot_dimension_numbers<[1], [0], [0], [1], [0, 0, 1, 1], [], []>} : vector<8x40xf32>, vector<40x256xf32>, vector<8x256xf32> -> vector<8x256xf32>
    %3 = vector.extract_strided_slice %2 {offsets = [0, 0], sizes = [8, 128], strides = [1, 1]} : vector<8x256xf32> to vector<8x128xf32>
    %c0_3 = arith.constant 0 : index
    %c0_4 = arith.constant 0 : index
    %4 = vector.load %arg3[%c0_3, %c0_4] : memref<1x128xf32, #tpu.memory_space<vmem>>, vector<1x128xf32>
    %5 = vector.broadcast %4 : vector<1x128xf32> to vector<8x128xf32>
    %6 = arith.addf %3, %5 : vector<8x128xf32>
    %cst_5 = arith.constant 0.000000e+00 : f32
    %7 = vector.broadcast %cst_5 : f32 to vector<8x128xf32>
    %8 = arith.cmpf ogt, %6, %7 : vector<8x128xf32>
    %cst_6 = arith.constant 0.00999999977 : f32
    %9 = vector.broadcast %cst_6 : f32 to vector<8x128xf32>
    %10 = arith.mulf %9, %6 : vector<8x128xf32>
    %11 = arith.select %8, %6, %10 : vector<8x128xi1>, vector<8x128xf32>
    %12 = vector.extract_strided_slice %2 {offsets = [0, 128], sizes = [8, 128], strides = [1, 1]} : vector<8x256xf32> to vector<8x128xf32>
    %c0_7 = arith.constant 0 : index
    %c0_8 = arith.constant 0 : index
    %13 = vector.load %arg4[%c0_7, %c0_8] : memref<128x128xf32, #tpu.memory_space<vmem>>, vector<128x128xf32>
    %cst_9 = arith.constant dense<0.000000e+00> : vector<8x128xf32>
    %14 = tpu.matmul %11, %13, %cst_9 {dimension_numbers = #tpu.dot_dimension_numbers<[1], [0], [0], [1], [0, 0, 1, 1], [], []>} : vector<8x128xf32>, vector<128x128xf32>, vector<8x128xf32> -> vector<8x128xf32>
    %15 = arith.addf %14, %12 : vector<8x128xf32>
    %c0_10 = arith.constant 0 : index
    %c0_11 = arith.constant 0 : index
    %16 = vector.load %arg5[%c0_10, %c0_11] : memref<1x128xf32, #tpu.memory_space<vmem>>, vector<1x128xf32>
    %17 = vector.broadcast %16 : vector<1x128xf32> to vector<8x128xf32>
    %18 = arith.addf %15, %17 : vector<8x128xf32>
    %cst_12 = arith.constant 0.000000e+00 : f32
    %19 = vector.broadcast %cst_12 : f32 to vector<8x128xf32>
    %20 = arith.cmpf ogt, %18, %19 : vector<8x128xf32>
    %cst_13 = arith.constant 0.00999999977 : f32
    %21 = vector.broadcast %cst_13 : f32 to vector<8x128xf32>
    %22 = arith.mulf %21, %18 : vector<8x128xf32>
    %23 = arith.select %20, %18, %22 : vector<8x128xi1>, vector<8x128xf32>
    %c0_14 = arith.constant 0 : index
    %c0_15 = arith.constant 0 : index
    %24 = vector.load %arg6[%c0_14, %c0_15] : memref<1x128xf32, #tpu.memory_space<vmem>>, vector<1x128xf32>
    %25 = vector.broadcast %24 : vector<1x128xf32> to vector<8x128xf32>
    %26 = arith.mulf %23, %25 : vector<8x128xf32>
    %cst_16 = arith.constant dense<0.000000e+00> : vector<8xf32>
    %27 = vector.multi_reduction <add>, %26, %cst_16 [1] : vector<8x128xf32> to vector<8xf32>
    %28 = vector.shape_cast %27 : vector<8xf32> to vector<1x8xf32>
    %c0_17 = arith.constant 0 : index
    %c0_18 = arith.constant 0 : index
    %29 = vector.load %arg7[%c0_17, %c0_18] : memref<1x1xf32, #tpu.memory_space<vmem>>, vector<1x1xf32>
    %30 = vector.broadcast %29 : vector<1x1xf32> to vector<1x8xf32>
    %31 = arith.addf %28, %30 : vector<1x8xf32>
    %c0_19 = arith.constant 0 : index
    %c0_20 = arith.constant 0 : index
    %32 = vector.load %arg8[%c0_19, %c0_20] : memref<1x8xf32, #tpu.memory_space<vmem>>, vector<1x8xf32>
    tpu.vector_store %arg8[%c0_19, %c0_20], %31 {strides = array<i32>} : memref<1x8xf32, #tpu.memory_space<vmem>>, vector<1x8xf32>,
    return
  }
  func.func @transform_0(%arg0: i32) -> (i32, i32) {
    %c0_i32 = arith.constant 0 : i32
    %c0_i32_0 = arith.constant 0 : i32
    return %arg0, %c0_i32 : i32, i32
  }
  func.func @transform_1(%arg0: i32) -> (i32, i32) {
    %c0_i32 = arith.constant 0 : i32
    %c0_i32_0 = arith.constant 0 : i32
    %c0_i32_1 = arith.constant 0 : i32
    return %c0_i32, %c0_i32_0 : i32, i32
  }
  func.func @transform_2(%arg0: i32) -> (i32, i32) {
    %c0_i32 = arith.constant 0 : i32
    %c0_i32_0 = arith.constant 0 : i32
    %c0_i32_1 = arith.constant 0 : i32
    return %c0_i32, %c0_i32_0 : i32, i32
  }
  func.func @transform_3(%arg0: i32) -> (i32, i32) {
    %c0_i32 = arith.constant 0 : i32
    %c0_i32_0 = arith.constant 0 : i32
    %c0_i32_1 = arith.constant 0 : i32
    return %c0_i32, %c0_i32_0 : i32, i32
  }
  func.func @transform_4(%arg0: i32) -> (i32, i32) {
    %c0_i32 = arith.constant 0 : i32
    %c0_i32_0 = arith.constant 0 : i32
    %c0_i32_1 = arith.constant 0 : i32
    return %c0_i32, %c0_i32_0 : i32, i32
  }
  func.func @transform_5(%arg0: i32) -> (i32, i32) {
    %c0_i32 = arith.constant 0 : i32
    %c0_i32_0 = arith.constant 0 : i32
    %c0_i32_1 = arith.constant 0 : i32
    return %c0_i32, %c0_i32_0 : i32, i32
  }
  func.func @transform_6(%arg0: i32) -> (i32, i32) {
    %c0_i32 = arith.constant 0 : i32
    %c0_i32_0 = arith.constant 0 : i32
    %c0_i32_1 = arith.constant 0 : i32
    return %c0_i32, %c0_i32_0 : i32, i32
  }
  func.func @transform_7(%arg0: i32) -> (i32, i32) {
    %c0_i32 = arith.constant 0 : i32
    %c0_i32_0 = arith.constant 0 : i32
    return %arg0, %c0_i32 : i32, i32
  }
}

</mosaic_0001>

<bundles_post_ra>
// kernel: tpu_custom_call.1
= control target key start
LH: loop header
LB: loop body
LE: loop exit
PB: predicated region body
PF: predicated region fallthrough
CT: control target
= control target key end

     0   :  { %s556_s0 = inlined_call_operand.hbm [shape: f32[8,40], index: 0, kind: input, shape index: {}]   ;;  %s557_s1 = inlined_call_operand.hbm [shape: f32[40,256], index: 1, kind: input, shape index: {}]   ;;  %s558_s2 = inlined_call_operand.vmem [shape: f32[1,128], index: 2, kind: input, shape index: {}]   ;;  %s559_s3 = inlined_call_operand.hbm [shape: f32[128,128], index: 3, kind: input, shape index: {}]   ;;  %s560_s4 = inlined_call_operand.vmem [shape: f32[1,128], index: 4, kind: input, shape index: {}]   ;;  %s561_s5 = inlined_call_operand.vmem [shape: f32[1,128], index: 5, kind: input, shape index: {}]   ;;  %s562_s6 = inlined_call_operand.<no memory space> [shape: f32[1,1], index: 6, kind: input, shape index: {}]   ;;  %s563_s7 = inlined_call_operand.hbm [shape: f32[1,8], index: 7, kind: output, shape index: {}]  }
   0x1   :  { %v12_v0 = vstv %s562_s6 }
   0x2   :  { %13 = vst [vmem:[#allocation2] sm:$0x1] %v12_v0 }
   0x3   :  { %14 = vsyncpa [#allocation4], 0 }
   0x4   :  { %15 = vsyncpa [#allocation7], 0 }
   0x5   :  { %16 = vsyncpa [#allocation5], 0  ;;  %s463_s26 = smov [#allocation6]  }
   0x6   :  { %s32_s27 = sshll.u32 %s463_s26, 4  ;;  %s33_s27 = int_to_ptr.vmem [resolvable:$true] %s32_s27 }
   0x7   :  { %s385_s28 = scalar_lea.vmem %s33_s27, 1280  ;;  %p390_p1 = scmp.lt.s32.totalorder %s33_s27, %s33_s27 }
   0x8   :  { %p386_p0 = scmp.ne.s32.totalorder %s33_s27, %s385_s28  ;;  %p391_p2 = scmp.lt.s32.totalorder %s385_s28, %s385_s28 }
   0xa   :  { %p392_p3 = por %p391_p2, %p390_p1 }
   0xc   :  { %p393_p4 = pnand %p392_p3, %p386_p0 }
   0xe   :  { %396 = shalt.err (!%p393_p4)
}
   0xf   :  { %s464_s29 = smov 256   ;;  %s465_s30 = smov 16  }
  0x10   :  { %38 = dma.hbm_to_vmem [thread:$0]  %s557_s1, 1280, %s33_s27, [#allocation7], %s464_s29, %s464_s29, %s465_s30  }
  0x11   :  { %s466_s6 = smov [#allocation3]   ;;  %s467_s11 = smov [#allocation8]  }
  0x12   :  { %s23_s10 = sshll.u32 %s466_s6, 4  ;;  %s46_s12 = sshll.u32 %s467_s11, 4  ;;  %s24_s10 = int_to_ptr.vmem [resolvable:$true] %s23_s10  ;;  %s47_s12 = int_to_ptr.vmem [resolvable:$true] %s46_s12 }
  0x13   :  { %s405_s13 = scalar_lea.vmem %s24_s10, 128  ;;  %p410_p6 = scmp.lt.s32.totalorder %s24_s10, %s24_s10 }
  0x14   :  { %p406_p5 = scmp.ne.s32.totalorder %s24_s10, %s405_s13  ;;  %p411_p7 = scmp.lt.s32.totalorder %s405_s13, %s405_s13 }
  0x16   :  { %p412_p8 = por %p411_p7, %p410_p6 }
  0x18   :  { %p413_p9 = pnand %p412_p8, %p406_p5 }
  0x1a   :  { %416 = shalt.err (!%p413_p9)
}
  0x1b   :  { %26 = dma.hbm_to_vmem [thread:$0]  %s556_s0, 128, %s24_s10, [#allocation4]  }
  0x1c   :  { %s425_s16 = scalar_lea.vmem %s47_s12, 2048  ;;  %p430_p11 = scmp.lt.s32.totalorder %s47_s12, %s47_s12 }
  0x1d   :  { %p426_p10 = scmp.ne.s32.totalorder %s47_s12, %s425_s16  ;;  %p431_p12 = scmp.lt.s32.totalorder %s425_s16, %s425_s16 }
  0x1f   :  { %p432_p13 = por %p431_p12, %p430_p11 }
  0x21   :  { %p433_p0 = pnand %p432_p13, %p426_p10 }
  0x23   :  { %436 = shalt.err (!%p433_p0)
}
  0x24   :  { %s468_s1 = smov 128   ;;  %s469_s17 = smov 8  }
  0x25   :  { %52 = dma.hbm_to_vmem [thread:$0]  %s559_s3, 2048, %s47_s12, [#allocation7], %s468_s1, %s468_s1, %s469_s17  }
  0x26   :  { %457 = dma.done.wait [#allocation4], 128  }
  0x27   :  { %458 = vsyncadd [#allocation4], 4294967168 }
  0x28   :  { %459 = dma.done.wait [#allocation7], 3328  }
  0x29   :  { %460 = vsyncadd [#allocation7], 4294963968  ;;  %v470_v1 = vmov 0.0   ;;  %v78_v2 = vld [vmem:[#allocation6 + $0x48] sm:$0xff]  ;;  %v77_v3 = vld [vmem:[#allocation6 + $0x40] sm:$0xff]  ;;  %vm79_vm0 = vcmask 326656   ;;  %v278_v46 = vlaneseq }
  0x2a   :  { %147 = vmatprep.mubr.f32.mxu0 %v470_v1  ;;  %330 = vmatprep.subr.mxu1 %v470_v1  ;;  %v76_v4 = vld [vmem:[#allocation6 + $0x38] sm:$0xff]  ;;  %v75_v5 = vld [vmem:[#allocation6 + $0x30] sm:$0xff]  ;;  %v74_v6 = vld [vmem:[#allocation6 + $0x28] sm:$0xff]  ;;  %vm471_vm1 = vmmov 0   ;;  %v472_v34 = vmov 0   ;;  %vm291_vm4 = vcmask 57344  }
  0x2b   :  { %105 = vmatprep.subr.mxu0 %v78_v2  ;;  %v73_v7 = vld [vmem:[#allocation6 + $0x20] sm:$0xff]  ;;  %v180_v8 = vld [vmem:[#allocation8 + $0x78] sm:$0xff]  ;;  %v72_v9 = vld [vmem:[#allocation6 + $0x18] sm:$0xff]  ;;  %362 = vmatprep.mubr.msk.f32.mxu1 %vm471_vm1, %v470_v1  ;;  %v279_v47 = vshrl.u32 %v278_v46, 7  ;;  %v285_v50 = vand.u32 127, %v278_v46 }
  0x2c   :  { %106 = vmatpush1.msra.mxu0 %v77_v3  ;;  %331 = vmatpush3.msra.mxu1 %v180_v8  ;;  %v179_v10 = vld [vmem:[#allocation8 + $0x70] sm:$0xff]  ;;  %v71_v11 = vld [vmem:[#allocation6 + $0x10] sm:$0xff]  ;;  %v178_v12 = vld [vmem:[#allocation8 + $0x68] sm:$0xff] }
  0x2d   :  { %107 = vmatprep.subr.mxu0 %v76_v4  ;;  %332 = vmatprep.subr.mxu1 %v470_v1  ;;  %v70_v13 = vld [vmem:[#allocation6 + $0x8] sm:$0xff]  ;;  %v69_v14 = vld [vmem:[#allocation6] sm:$0xff]  ;;  %v177_v15 = vld [vmem:[#allocation8 + $0x60] sm:$0xff]  ;;  %v280_v49 = vsub.s32 0, %v279_v47  ;;  %v288_v52 = vsub.s32 %v285_v50, %v279_v47 }
  0x2e   :  { %108 = vmatpush1.msra.mxu0 %v75_v5  ;;  %333 = vmatpush3.msra.mxu1 %v179_v10  ;;  %v68_v16 = vld [vmem:[#allocation3] sm:$0xff]  ;;  %v176_v17 = vld [vmem:[#allocation8 + $0x58] sm:$0xff]  ;;  %v175_v18 = vld [vmem:[#allocation8 + $0x50] sm:$0xff] }
  0x2f   :  { %109 = vmatprep.subr.mxu0 %v74_v6  ;;  %334 = vmatprep.subr.mxu1 %v470_v1  ;;  %v174_v19 = vld [vmem:[#allocation8 + $0x48] sm:$0xff]  ;;  %v173_v20 = vld [vmem:[#allocation8 + $0x40] sm:$0xff]  ;;  %v172_v21 = vld [vmem:[#allocation8 + $0x38] sm:$0xff] }
  0x30   :  { %110 = vmatpush1.msra.mxu0 %v73_v7  ;;  %335 = vmatpush3.msra.mxu1 %v178_v12  ;;  %v171_v22 = vld [vmem:[#allocation8 + $0x30] sm:$0xff]  ;;  %v170_v23 = vld [vmem:[#allocation8 + $0x28] sm:$0xff]  ;;  %v169_v24 = vld [vmem:[#allocation8 + $0x20] sm:$0xff] }
  0x31   :  { %111 = vmatprep.subr.mxu0 %v72_v9  ;;  %336 = vmatprep.subr.mxu1 %v470_v1  ;;  %v168_v25 = vld [vmem:[#allocation8 + $0x18] sm:$0xff]  ;;  %v167_v26 = vld [vmem:[#allocation8 + $0x10] sm:$0xff]  ;;  %v166_v27 = vld [vmem:[#allocation8 + $0x8] sm:$0xff] }
  0x32   :  { %112 = vmatpush1.msra.mxu0 %v71_v11  ;;  %337 = vmatpush3.msra.mxu1 %v177_v15  ;;  %v165_v28 = vld [vmem:[#allocation8] sm:$0xff] }
  0x33   :  { %113 = vmatprep.subr.mxu0 %v70_v13  ;;  %338 = vmatprep.subr.mxu1 %v470_v1  ;;  %v310_v29 = vld [vmem:[%s558_s2] ss:$0 sm:$0xff] }
  0x34   :  { %114 = vmatpush1.msra.mxu0 %v69_v14  ;;  %339 = vmatpush3.msra.mxu1 %v176_v17  ;;  %v311_v37 = vld [vmem:[%s560_s4] ss:$0 sm:$0xff]  ;;  %s473_s4 = smov [#allocation9]  }
  0x35   :  { %309 = vmatmul.mubr.msk.f32.vlgmr.msra.gmra.mxu0 %vm79_vm0, %v68_v16  ;;  %340 = vmatprep.subr.mxu1 %v470_v1  ;;  %v312_v42 = vld [vmem:[%s561_s5] ss:$0 sm:$0xff]  ;;  %s299_s23 = sshll.u32 %s473_s4, 4  ;;  %s300_s23 = int_to_ptr.vmem [resolvable:$true] %s299_s23 }
  0x36   :  { %341 = vmatpush3.msra.mxu1 %v175_v18  ;;  %376 = vset.pattern.permute.xlu0 %v472_v34  ;;  %v272_v45 = vld [vmem:[#allocation2] sm:$0x1]  ;;  %s437_s5 = scalar_lea.vmem %s300_s23, 16  ;;  %s441_s24 = scalar_lea.vmem %s300_s23, 32 }
  0x37   :  { %342 = vmatprep.subr.mxu1 %v470_v1  ;;  %p438_p1 = scmp.ne.s32.totalorder %s300_s23, %s437_s5  ;;  %p442_p2 = scmp.lt.s32.totalorder %s300_s23, %s300_s23 }
  0x38   :  { %343 = vmatpush3.msra.mxu1 %v174_v19  ;;  %p443_p3 = scmp.lt.s32.totalorder %s441_s24, %s437_s5 }
  0x39   :  { %344 = vmatprep.subr.mxu1 %v470_v1 }
  0x3a   :  { %345 = vmatpush3.msra.mxu1 %v173_v20  ;;  %p444_p4 = por %p443_p3, %p442_p2 }
  0x3b   :  { %346 = vmatprep.subr.mxu1 %v470_v1 }
  0x3c   :  { %347 = vmatpush3.msra.mxu1 %v172_v21  ;;  %p445_p5 = pnand %p444_p4, %p438_p1 }
  0x3d   :  { %348 = vmatprep.subr.mxu1 %v470_v1 }
  0x3e   :  { %349 = vmatpush3.msra.mxu1 %v171_v22 }
  0x3f   :  { %350 = vmatprep.subr.mxu1 %v470_v1 }
  0x40   :  { %351 = vmatpush3.msra.mxu1 %v170_v23 }
  0x41   :  { %352 = vmatprep.subr.mxu1 %v470_v1 }
  0x42   :  { %353 = vmatpush3.msra.mxu1 %v169_v24 }
  0x43   :  { %354 = vmatprep.subr.mxu1 %v470_v1 }
  0x44   :  { %355 = vmatpush3.msra.mxu1 %v168_v25 }
  0x45   :  { %356 = vmatprep.subr.mxu1 %v470_v1 }
  0x46   :  { %357 = vmatpush3.msra.mxu1 %v167_v26 }
  0x47   :  { %358 = vmatprep.subr.mxu1 %v470_v1 }
  0x48   :  { %359 = vmatpush3.msra.mxu1 %v166_v27 }
  0x49   :  { %360 = vmatprep.subr.mxu1 %v470_v1 }
  0x4a   :  { %361 = vmatpush3.msra.mxu1 %v165_v28 }
  0xf5   :  { %v149_v30 = vpop.f32.mrf.mxu0 }
  0xf6   :  { %v161_v31 = vadd.f32 %v310_v29, %v149_v30 }
  0xf7   :  { %v151_v35 = vpop.f32.mrf.mxu0 }
  0xf8   :  { %v163_v32 = vmul.f32 0.01, %v161_v31  ;;  %vm162_vm2 = vcmp.gt.f32.partialorder %v161_v31, 0.0 }
  0xfa   :  { %v164_v33 = vsel %vm162_vm2, %v161_v31, %v163_v32 }
  0xfb   :  { %363 = vmatmul.mubr.f32.vlgmr.msra.gmra.mxu1 %v164_v33 }
 0x1bb   :  { %v247_v36 = vpop.f32.mrf.mxu1 }
 0x1bc   :  { %v248_v38 = vadd.f32 %v247_v36, %v151_v35 }
 0x1bd   :  { %v364_v39 = vpop.f32.mrf.mxu1 }
 0x1be   :  { %v258_v40 = vadd.f32 %v311_v37, %v248_v38 }
 0x1c0   :  { %vm259_vm3 = vcmp.gt.f32.partialorder %v258_v40, 0.0  ;;  %v260_v41 = vmul.f32 0.01, %v258_v40 }
 0x1c2   :  { %v261_v43 = vsel %vm259_vm3, %v258_v40, %v260_v41 }
 0x1c3   :  { %v269_v44 = vmul.f32 %v312_v42, %v261_v43 }
 0x1c5   :  { %270 = vadd.xlane.f32.xlu0 %v269_v44 }
 0x1db   :  { %275 = vperm.xlu0 %376, %v272_v45  }
 0x24e   :  { %v271_v48 = vpop.xlane.xlu0 %270 }
 0x256   :  { %v276_v51 = vpop.permute.xlu0 %275 }
 0x257   :  { %v281_v53 = vrot.slane %v276_v51, %v280_v49 }
 0x259   :  { %v282_v54 = vadd.f32 %v281_v53, %v271_v48 }
 0x25b   :  { %v289_v55 = vrot.slane %v282_v54, %v288_v52 }
 0x25d   :  { %292 = vst.msk [vmem:[#allocation9] sm:$0x1] %vm291_vm4, %v289_v55 }
 0x25e   :  { %448 = shalt.err (!%p445_p5)
}
 0x25f   :  { %302 = dma.vmem_to_hbm [thread:$0]  %s300_s23, 16, %s563_s7, [#allocation5]  }
 0x260   :  { %461 = dma.done.wait [#allocation5], 16  }
 0x261   :  { %462 = vsyncadd [#allocation5], 4294967280 }
 0x262   :  { %306 = vsyncpa [#allocation4], 1 }
 0x263   :  { %307 = vsyncpa [#allocation7], 1 }
 0x264   :  { %308 = vsyncpa [#allocation5], 1 }

</bundles_post_ra>
